<compile_context>
chip_gen: v6e
topology: v6e:2x2x1
jax: 0.10.0
libtpu: 0.0.40
codegen_flags: <defaults>
</compile_context>

<pallas_src>
import jax
import jax.numpy as jnp
from jax import lax
from jax.experimental import pallas as pl
from jax.experimental.pallas import tpu as pltpu


_SMEM = pl.BlockSpec(memory_space=pltpu.SMEM)


# -----------------------------------------------------------------------------
# 1) Single control step (matches pid_loss.forward), scalar SMEM kernel.
# -----------------------------------------------------------------------------
def _make_pid_step_kernel(min_v: float, max_v: float, dt: float):
    min_v = float(min_v)
    max_v = float(max_v)
    dt = float(dt)
    inv_dt = 1.0 / dt  # compile-time constant

    def kernel(params_ref, state_ref, u_ref, state_out_ref):
        # params = [kp, ki, kd, measure, target, abnormal]
        kp = params_ref[0]
        ki = params_ref[1]
        kd = params_ref[2]
        measure = params_ref[3]
        target = params_ref[4]
        abnormal = params_ref[5]
        # state = [ei, ed, pre_err]
        ei = state_ref[0]
        ed = state_ref[1]
        pre_err = state_ref[2]

        error = target - measure
        u = kp * error + ki * ei + kd * ed
        in_range = jnp.logical_and(u > min_v, u < max_v)

        u_ref[0] = jnp.where(in_range, u, abnormal)
        state_out_ref[0] = jnp.where(in_range, ei + error * dt, ei)
        state_out_ref[1] = jnp.where(in_range, (error - pre_err) * inv_dt, ed)
        state_out_ref[2] = jnp.where(in_range, error, pre_err)

    return kernel


class PidLossPallas:
    """Single-step, functional-state port of BP_PID.pid_loss (Pallas TPU).

    NOTE: stateful Python object (mutates self.state) -- not safe to trace
    through jit/vmap/grad from the outside; the per-step dispatch itself IS
    a single jitted call with the state buffer donated (in-place update).
    """

    def __init__(self, min_v: float, max_v: float, dt: float):
        self.min = float(min_v)
        self.max = float(max_v)
        self.dt = float(dt)
        # carried state: [ei, ed, pre_err]
        self.state = jnp.zeros((3,), jnp.float32)

        f32 = jnp.float32
        step_call = pl.pallas_call(
            _make_pid_step_kernel(self.min, self.max, self.dt),
            in_specs=[_SMEM, _SMEM],
            out_specs=(_SMEM, _SMEM),
            out_shape=(jax.ShapeDtypeStruct((1,), f32),
                       jax.ShapeDtypeStruct((3,), f32)),
            # state input (arg 1) updated in place into state output (out 1)
            input_output_aliases={1: 1},
        )

        def _step(kp, ki, kd, measure, target, abnormal, state):
            params = jnp.stack(
                [jnp.asarray(v, f32).reshape(())
                 for v in (kp, ki, kd, measure, target, abnormal)])
            return step_call(params, state)

        # One fused dispatch per control step; donated state -> no per-step
        # reallocation of the carried [ei, ed, pre_err] buffer.
        self._step = jax.jit(_step, donate_argnums=(6,))

    def forward(self, pid_input, measure, target, abnormal):
        kp, ki, kd = pid_input
        u, self.state = self._step(kp, ki, kd, measure, target, abnormal,
                                   self.state)
        return u

    __call__ = forward


# -----------------------------------------------------------------------------
# 2) Fused N-step scalar rollout: whole trajectory in one pallas_call.
#    Inputs packed into ONE flat SMEM array: [kp, ki, kd, meas(N), targ(N),
#    abn(N)].  Time loop is lax.fori_loop with scalar carries (serial chain).
# -----------------------------------------------------------------------------
def _make_pid_rollout_kernel(min_v: float, max_v: float, dt: float,
                             n_steps: int):
    min_v = float(min_v)
    max_v = float(max_v)
    dt = float(dt)
    inv_dt = 1.0 / dt
    n_steps = int(n_steps)

    def kernel(data_ref, state_ref, u_hist_ref, state_out_ref):
        kp = data_ref[0]
        ki = data_ref[1]
        kd = data_ref[2]

        def body(t, carry):
            ei, ed, pre_err = carry
            meas = data_ref[3 + t]
            targ = data_ref[3 + n_steps + t]
            abn = data_ref[3 + 2 * n_steps + t]
            error = targ - meas
            u = kp * error + ki * ei + kd * ed
            in_range = jnp.logical_and(u > min_v, u < max_v)
            u_hist_ref[t] = jnp.where(in_range, u, abn)
            ei_n = jnp.where(in_range, ei + error * dt, ei)
            ed_n = jnp.where(in_range, (error - pre_err) * inv_dt, ed)
            pre_n = jnp.where(in_range, error, pre_err)
            return ei_n, ed_n, pre_n

        # fori_loop keeps scalar code size O(1) in n_steps; the recurrence is
        # a serial scalar dependence chain so unrolling adds no throughput.
        ei, ed, pre_err = lax.fori_loop(
            0, n_steps, body,
            (state_ref[0], state_ref[1], state_ref[2]))

        state_out_ref[0] = ei
        state_out_ref[1] = ed
        state_out_ref[2] = pre_err

    return kernel


def pid_rollout(min_v, max_v, dt, pid_input, measures, targets, abnormals,
                init_state=None):
    """Fused N-step PID rollout: one pallas_call, 2 SMEM input refs."""
    f32 = jnp.float32
    n_steps = int(measures.shape[0])
    kp, ki, kd = pid_input
    gains = jnp.stack([jnp.asarray(v, f32).reshape(()) for v in (kp, ki, kd)])
    data = jnp.concatenate([gains, measures.astype(f32),
                            targets.astype(f32), abnormals.astype(f32)])
    if init_state is None:
        init_state = jnp.zeros((3,), f32)

    call = pl.pallas_call(
        _make_pid_rollout_kernel(min_v, max_v, dt, n_steps),
        in_specs=[_SMEM, _SMEM],
        out_specs=(_SMEM, _SMEM),
        out_shape=(jax.ShapeDtypeStruct((n_steps,), f32),
                   jax.ShapeDtypeStruct((3,), f32)),
        # carried state (arg 1) aliased in place into state output (out 1)
        input_output_aliases={1: 1},
    )
    # TODO(synk): for very long rollouts (tens of thousands of steps) switch to
    # a 1-D grid over time chunks to bound the 1-D SMEM footprint.
    return call(data, init_state)


# -----------------------------------------------------------------------------
# 3) Batched VPU variant: many independent controllers, lane-dense VMEM tiles,
#    grid over batch tiles, time as the serial in-kernel loop.
# -----------------------------------------------------------------------------
def _make_pid_batched_kernel(min_v: float, max_v: float, dt: float,
                             n_steps: int):
    min_v = float(min_v)
    max_v = float(max_v)
    dt = float(dt)
    inv_dt = 1.0 / dt
    n_steps = int(n_steps)

    def kernel(gains_ref, meas_ref, targ_ref, abn_ref, u_ref, state_ref):
        kp = gains_ref[0]
        ki = gains_ref[1]
        kd = gains_ref[2]
        tb = meas_ref.shape[1]

        ei = jnp.zeros((1, tb), jnp.float32)
        ed = jnp.zeros((1, tb), jnp.float32)
        pre = jnp.zeros((1, tb), jnp.float32)

        # n_steps is a small compile-time constant here: static Python unroll
        # keeps all row indices static (unmasked vector loads / stores).
        for t in range(n_steps):
            meas = meas_ref[pl.ds(t, 1), :]
            targ = targ_ref[pl.ds(t, 1), :]
            abn = abn_ref[pl.ds(t, 1), :]
            error = targ - meas
            u = kp * error + ki * ei + kd * ed
            in_range = jnp.logical_and(u > min_v, u < max_v)
            u_ref[pl.ds(t, 1), :] = jnp.where(in_range, u, abn)
            ei_n = jnp.where(in_range, ei + error * dt, ei)
            ed_n = jnp.where(in_range, (error - pre) * inv_dt, ed)
            pre = jnp.where(in_range, error, pre)
            ei, ed = ei_n, ed_n

        # final state rows: [ei, ed, pre_err, 0...]; padded to 8 sublanes
        state_ref[...] = jnp.concatenate(
            [ei, ed, pre, jnp.zeros((5, tb), jnp.float32)], axis=0)

    return kernel


def pid_rollout_batched(min_v, max_v, dt, pid_input, measures, targets,
                        abnormals, tile_b=128):
    """Batched PID rollout over `batch` independent controllers (zero-init
    state), vectorized on the VPU; grid over batch tiles (parallel)."""
    f32 = jnp.float32
    n_steps, batch = measures.shape
    assert batch % tile_b == 0, "batch must be a multiple of the lane tile"
    kp, ki, kd = pid_input
    gains = jnp.stack([jnp.asarray(v, f32).reshape(()) for v in (kp, ki, kd)])

    data_spec = pl.BlockSpec((n_steps, tile_b), lambda b: (0, b))
    return pl.pallas_call(
        _make_pid_batched_kernel(min_v, max_v, dt, n_steps),
        grid=(batch // tile_b,),
        in_specs=[_SMEM, data_spec, data_spec, data_spec],
        out_specs=(pl.BlockSpec((n_steps, tile_b), lambda b: (0, b)),
                   pl.BlockSpec((8, tile_b), lambda b: (0, b))),
        out_shape=(jax.ShapeDtypeStruct((n_steps, batch), f32),
                   jax.ShapeDtypeStruct((8, batch), f32)),
        compiler_params=pltpu.CompilerParams(
            dimension_semantics=("parallel",)),
    )(gains, measures.astype(f32), targets.astype(f32), abnormals.astype(f32))


# -----------------------------------------------------------------------------
# Pure-JAX references mirroring the PyTorch semantics.
# -----------------------------------------------------------------------------
def _reference_rollout(min_v, max_v, dt, pid_input, measures, targets,
                       abnormals):
    kp, ki, kd = [jnp.asarray(v, jnp.float32) for v in pid_input]
    inv_dt = 1.0 / float(dt)
    dt = float(dt)
    ei = jnp.float32(0.0)
    ed = jnp.float32(0.0)
    pre = jnp.float32(0.0)
    us = []
    for t in range(int(measures.shape[0])):
        error = targets[t] - measures[t]
        u = kp * error + ki * ei + kd * ed
        in_range = jnp.logical_and(u > min_v, u < max_v)
        us.append(jnp.where(in_range, u, abnormals[t]))
        ei_n = jnp.where(in_range, ei + error * dt, ei)
        ed_n = jnp.where(in_range, (error - pre) * inv_dt, ed)
        pre = jnp.where(in_range, error, pre)
        ei, ed = ei_n, ed_n
    return jnp.stack(us), jnp.stack([ei, ed, pre])


def _reference_rollout_batched(min_v, max_v, dt, pid_input, measures, targets,
                               abnormals):
    kp, ki, kd = [jnp.asarray(v, jnp.float32) for v in pid_input]
    inv_dt = 1.0 / float(dt)
    dt = float(dt)
    batch = measures.shape[1]
    ei = jnp.zeros((batch,), jnp.float32)
    ed = jnp.zeros((batch,), jnp.float32)
    pre = jnp.zeros((batch,), jnp.float32)
    us = []
    for t in range(int(measures.shape[0])):
        error = targets[t] - measures[t]
        u = kp * error + ki * ei + kd * ed
        in_range = jnp.logical_and(u > min_v, u < max_v)
        us.append(jnp.where(in_range, u, abnormals[t]))
        ei_n = jnp.where(in_range, ei + error * dt, ei)
        ed_n = jnp.where(in_range, (error - pre) * inv_dt, ed)
        pre = jnp.where(in_range, error, pre)
        ei, ed = ei_n, ed_n
    return jnp.stack(us), jnp.stack([ei, ed, pre])


if __name__ == "__main__":
    key = jax.random.PRNGKey(0)
    k1, k2, k3, k4, k5, k6, k7 = jax.random.split(key, 7)

    min_v, max_v, dt = -10.0, 10.0, 0.1
    n_steps = 8

    kp = jax.random.uniform(k1, (), jnp.float32, 0.5, 1.5)
    ki = jax.random.uniform(k2, (), jnp.float32, 0.0, 0.5)
    kd = jax.random.uniform(k3, (), jnp.float32, 0.0, 0.5)
    measures = jax.random.normal(k4, (n_steps,), jnp.float32)
    targets = jax.random.normal(k5, (n_steps,), jnp.float32) + 1.0
    # force one step out of the (min, max) band to exercise the abnormal branch
    targets = targets.at[3].set(50.0)
    abnormals = jnp.full((n_steps,), 99.0, jnp.float32)

    u_expect, state_expect = _reference_rollout(
        min_v, max_v, dt, (kp, ki, kd), measures, targets, abnormals)

    # 1) module-style single-step kernel, one jitted dispatch per step
    pid = PidLossPallas(min_v, max_v, dt)
    u_steps = jnp.concatenate(
        [pid((kp, ki, kd), measures[t], targets[t], abnormals[t])
         for t in range(n_steps)])

    # 2) fused scalar rollout: whole trajectory in a single pallas_call
    u_fused, state_fused = pid_rollout(
        min_v, max_v, dt, (kp, ki, kd), measures, targets, abnormals)

    # 3) batched VPU rollout: 256 independent controllers, grid over lane tiles
    batch = 256
    measures_b = jax.random.normal(k6, (n_steps, batch), jnp.float32)
    targets_b = jax.random.normal(k7, (n_steps, batch), jnp.float32) + 1.0
    targets_b = targets_b.at[3, ::7].set(60.0)   # hit the abnormal branch
    abnormals_b = jnp.full((n_steps, batch), 99.0, jnp.float32)

    u_batch, state_batch = pid_rollout_batched(
        min_v, max_v, dt, (kp, ki, kd), measures_b, targets_b, abnormals_b)
    u_batch_expect, state_batch_expect = _reference_rollout_batched(
        min_v, max_v, dt, (kp, ki, kd), measures_b, targets_b, abnormals_b)

    jax.block_until_ready((u_steps, u_fused, state_fused, u_batch, state_batch))

    assert jnp.allclose(u_steps, u_expect, atol=1e-5, rtol=1e-5), \
        "single-step Pallas PID does not match reference"
    assert jnp.allclose(pid.state, state_expect, atol=1e-5, rtol=1e-5), \
        "single-step carried state does not match reference"
    assert jnp.allclose(u_fused, u_expect, atol=1e-5, rtol=1e-5), \
        "fused rollout Pallas PID does not match reference"
    assert jnp.allclose(state_fused, state_expect, atol=1e-5, rtol=1e-5), \
        "fused rollout final state does not match reference"
    assert jnp.allclose(u_batch, u_batch_expect, atol=1e-5, rtol=1e-5), \
        "batched rollout Pallas PID does not match reference"
    assert jnp.allclose(state_batch[:3], state_batch_expect,
                        atol=1e-5, rtol=1e-5), \
        "batched rollout final state does not match reference"

    print("KERNEL_OK")
</pallas_src>

<mosaic_0001>
module attributes {stable_mosaic.version = 11 : i64} {
  func.func @kernel(%arg0: memref<6xf32, #tpu.memory_space<smem>>, %arg1: memref<3xf32, #tpu.memory_space<smem>>, %arg2: memref<1xf32, #tpu.memory_space<smem>>, %arg3: memref<3xf32, #tpu.memory_space<smem>>) attributes {dimension_semantics = [], scalar_prefetch = 0 : i64, scratch_operands = 0 : i64, tpu.core_type = #tpu.core_type<tc>} {
    %c0 = arith.constant 0 : index
    %0 = memref.load %arg0[%c0] : memref<6xf32, #tpu.memory_space<smem>>
    %c1 = arith.constant 1 : index
    %1 = memref.load %arg0[%c1] : memref<6xf32, #tpu.memory_space<smem>>
    %c2 = arith.constant 2 : index
    %2 = memref.load %arg0[%c2] : memref<6xf32, #tpu.memory_space<smem>>
    %c3 = arith.constant 3 : index
    %3 = memref.load %arg0[%c3] : memref<6xf32, #tpu.memory_space<smem>>
    %c4 = arith.constant 4 : index
    %4 = memref.load %arg0[%c4] : memref<6xf32, #tpu.memory_space<smem>>
    %c5 = arith.constant 5 : index
    %5 = memref.load %arg0[%c5] : memref<6xf32, #tpu.memory_space<smem>>
    %c0_0 = arith.constant 0 : index
    %6 = memref.load %arg1[%c0_0] : memref<3xf32, #tpu.memory_space<smem>>
    %c1_1 = arith.constant 1 : index
    %7 = memref.load %arg1[%c1_1] : memref<3xf32, #tpu.memory_space<smem>>
    %c2_2 = arith.constant 2 : index
    %8 = memref.load %arg1[%c2_2] : memref<3xf32, #tpu.memory_space<smem>>
    %9 = arith.subf %4, %3 : f32
    %10 = arith.mulf %0, %9 : f32
    %11 = arith.mulf %1, %6 : f32
    %12 = arith.addf %10, %11 : f32
    %13 = arith.mulf %2, %7 : f32
    %14 = arith.addf %12, %13 : f32
    %cst = arith.constant -1.000000e+01 : f32
    %15 = arith.cmpf ogt, %14, %cst : f32
    %cst_3 = arith.constant 1.000000e+01 : f32
    %16 = arith.cmpf olt, %14, %cst_3 : f32
    %17 = arith.andi %15, %16 : i1
    %18 = arith.select %17, %14, %5 : f32
    %c0_4 = arith.constant 0 : index
    %19 = memref.load %arg2[%c0_4] : memref<1xf32, #tpu.memory_space<smem>>
    memref.store %18, %arg2[%c0_4] : memref<1xf32, #tpu.memory_space<smem>>
    %cst_5 = arith.constant 1.000000e-01 : f32
    %20 = arith.mulf %9, %cst_5 : f32
    %21 = arith.addf %6, %20 : f32
    %22 = arith.select %17, %21, %6 : f32
    %c0_6 = arith.constant 0 : index
    %23 = memref.load %arg3[%c0_6] : memref<3xf32, #tpu.memory_space<smem>>
    memref.store %22, %arg3[%c0_6] : memref<3xf32, #tpu.memory_space<smem>>
    %24 = arith.subf %9, %8 : f32
    %cst_7 = arith.constant 1.000000e+01 : f32
    %25 = arith.mulf %24, %cst_7 : f32
    %26 = arith.select %17, %25, %7 : f32
    %c1_8 = arith.constant 1 : index
    %27 = memref.load %arg3[%c1_8] : memref<3xf32, #tpu.memory_space<smem>>
    memref.store %26, %arg3[%c1_8] : memref<3xf32, #tpu.memory_space<smem>>
    %28 = arith.select %17, %9, %8 : f32
    %c2_9 = arith.constant 2 : index
    %29 = memref.load %arg3[%c2_9] : memref<3xf32, #tpu.memory_space<smem>>
    memref.store %28, %arg3[%c2_9] : memref<3xf32, #tpu.memory_space<smem>>
    return
  }
}

</mosaic_0001>

<bundles_post_ra>
// kernel: _step.1
= control target key start
LH: loop header
LB: loop body
LE: loop exit
PB: predicated region body
PF: predicated region fallthrough
CT: control target
= control target key end

     0   :  { %9 = vsyncpa [#allocation5], 0  ;;  %s195_s0 = inlined_call_operand.vmem [shape: f32[6], index: 0, kind: input, shape index: {}]   ;;  %s196_s1 = inlined_call_operand.hbm [shape: f32[3], index: 1, kind: input, shape index: {}, may-alias: {1,3}]   ;;  %s197_s2 = inlined_call_operand.hbm [shape: f32[1], index: 2, kind: output, shape index: {0}]   ;;  %s198_s3 = inlined_call_operand.hbm [shape: f32[3], index: 3, kind: output, shape index: {1}, may-alias: {1,3}]  }
   0x1   :  { %10 = vsyncpa [#allocation3], 0 }
   0x2   :  { %11 = vsyncpa [#allocation4], 0 }
   0x3   :  { %12 = vsyncpa [#allocation9], 0  ;;  %s19_s14 = sshll.u32 %s195_s0, 4  ;;  %s20_s14 = int_to_ptr.vmem [resolvable:$true] %s19_s14 }
   0x4   :  { %s115_s15 = scalar_lea.vmem %s20_s14, 16  ;;  %p120_p1 = scmp.lt.s32.totalorder %s20_s14, %s20_s14 }
   0x5   :  { %p116_p0 = scmp.ne.s32.totalorder %s20_s14, %s115_s15  ;;  %p121_p2 = scmp.lt.s32.totalorder %s115_s15, %s115_s15 }
   0x7   :  { %p122_p3 = por %p121_p2, %p120_p1 }
   0x9   :  { %p123_p4 = pnand %p122_p3, %p116_p0 }
   0xb   :  { %126 = shalt.err (!%p123_p4)
}
   0xc   :  { %s159_s16 = smov [#allocation2]   ;;  %s160_s17 = smov [#allocation6]  }
   0xd   :  { %22 = dma.vmem_to_smem %s20_s14, 16, %s159_s16, [#allocation5]  }
   0xe   :  { %30 = dma.hbm_to_smem %s196_s1, 16, %s160_s17, [#allocation3]  }
   0xf   :  { %151 = dma.done.wait [#allocation5], 16  }
  0x10   :  { %152 = vsyncadd [#allocation5], 4294967280 }
  0x11   :  { %153 = dma.done.wait [#allocation3], 16  }
  0x12   :  { %154 = vsyncadd [#allocation3], 4294967280 }
  0x13   :  { %37 = sfence }
  0x14   :  { %s38_s0 = sld [smem:[#allocation2]]  ;;  %s161_s10 = smov [#allocation7]  }
  0x15   :  { %s100_s20 = sld [smem:[#allocation2 + $0x1]]  ;;  %s162_s13 = smov [#allocation8]  }
  0x16   :  { %s102_s21 = sld [smem:[#allocation2 + $0x3]] }
  0x17   :  { %s103_s22 = sld [smem:[#allocation2 + $0x4]] }
  0x18   :  { %s101_s23 = sld [smem:[#allocation2 + $0x2]] }
  0x19   :  { %s44_s24 = sld [smem:[#allocation6]] }
  0x1a   :  { %s105_s25 = sld [smem:[#allocation6 + $0x1]] }
  0x1b   :  { %s106_s26 = sld [smem:[#allocation6 + $0x2]] }
  0x1c   :  { %s104_s30 = sld [smem:[#allocation2 + $0x5]] }
  0x1d   :  { %s47_s27 = ssub.f32 %s103_s22, %s102_s21 }
  0x1f   :  { %s48_s28 = smul.f32 %s47_s27, %s38_s0 }
  0x20   :  { %s49_s29 = smul.f32 %s100_s20, %s44_s24 }
  0x21   :  { %s51_s4 = smul.f32 %s105_s25, %s101_s23  ;;  %s65_s7 = ssub.f32 %s47_s27, %s106_s26 }
  0x22   :  { %s50_s5 = sadd.f32 %s49_s29, %s48_s28  ;;  %s60_s1 = smul.f32 0.1, %s47_s27 }
  0x23   :  { %s66_s9 = smul.f32 10.0, %s65_s7 }
  0x24   :  { %s52_s6 = sadd.f32 %s51_s4, %s50_s5 }
  0x25   :  { %s61_s8 = sadd.f32 %s60_s1, %s44_s24 }
  0x26   :  { %p53_p5 = scmp.gt.f32.partialorder %s52_s6, -10.0  ;;  %p54_p6 = scmp.lt.f32.partialorder %s52_s6, 10.0 }
  0x28   :  { %p55_p7 = pnand %p54_p6, %p53_p5 }
  0x2a   :  { %s200_s30 = smov (!%p55_p7, %s104_s30), %s52_s6  ;;  %s202_s24 = smov (!%p55_p7, %s44_s24), %s61_s8 }
  0x2b   :  { %59 = sst [smem:[#allocation7]] %s200_s30  ;;  %s204_s25 = smov (!%p55_p7, %s105_s25), %s66_s9 }
  0x2c   :  { %80 = dma.smem_to_hbm %s161_s10, 16, %s197_s2, [#allocation4]  }
  0x2d   :  { %64 = sst [smem:[#allocation8]] %s202_s24  ;;  %s206_s26 = smov (!%p55_p7, %s106_s26), %s47_s27 }
  0x2e   :  { %69 = sst [smem:[#allocation8 + $0x1]] %s204_s25 }
  0x2f   :  { %72 = sst [smem:[#allocation8 + $0x2]] %s206_s26 }
  0x30   :  { %88 = dma.smem_to_hbm %s162_s13, 16, %s198_s3, [#allocation9]  }
  0x31   :  { %155 = dma.done.wait [#allocation4], 16  }
  0x32   :  { %156 = vsyncadd [#allocation4], 4294967280 }
  0x33   :  { %157 = dma.done.wait [#allocation9], 16  }
  0x34   :  { %158 = vsyncadd [#allocation9], 4294967280 }
  0x35   :  { %95 = sfence }
  0x36   :  { %96 = vsyncpa [#allocation3], 1 }
  0x37   :  { %97 = vsyncpa [#allocation4], 1 }
  0x38   :  { %98 = vsyncpa [#allocation9], 1 }
  0x39   :  { %99 = vsyncpa [#allocation5], 1 }

</bundles_post_ra>
